<compile_context>
chip_gen: v5e
topology: v5e:2x2
jax: 0.10.0
libtpu: 0.0.40
codegen_flags: <defaults>
</compile_context>

<pallas_src>
import math
import functools

import jax
import jax.numpy as jnp
from jax import lax
from jax.experimental import pallas as pl
from jax.experimental.pallas import tpu as pltpu


# ---------------------------------------------------------------------------
# Parameter setup (deterministic, mirrors PyTorch __init__)
# ---------------------------------------------------------------------------
def build_positional_encoding_table(max_len, d_model, dtype=jnp.float32):
    """pe[max_len, 1, d_model], identical math to the PyTorch buffer."""
    assert d_model % 2 == 0, "d_model must be even (same limitation as the PyTorch module)"
    position = jnp.arange(max_len, dtype=jnp.float32)[:, None]              # (L, 1)
    div_term = jnp.exp(
        jnp.arange(0, d_model, 2, dtype=jnp.float32) * (-math.log(10000.0) / d_model)
    )                                                                        # (D/2,)
    pe = jnp.zeros((max_len, d_model), dtype=jnp.float32)
    pe = pe.at[:, 0::2].set(jnp.sin(position * div_term))
    pe = pe.at[:, 1::2].set(jnp.cos(position * div_term))
    # unsqueeze(0).transpose(0, 1) -> (max_len, 1, d_model)
    return pe[:, None, :].astype(dtype)


def _round_up(x, m):
    return ((x + m - 1) // m) * m


# ---------------------------------------------------------------------------
# Pallas kernel (operates on the lane-dense 2-D view)
# ---------------------------------------------------------------------------
def _pe_kernel(seed_ref, x_ref, pe_ref, o_ref, *, batch_block, d_model, p, tile_rows):
    """x_ref/o_ref: (ts, batch_block*D); pe_ref: (ts, D).

    Adds pe to each batch lane-slice (pe vregs stay resident; no jnp.tile
    materialization). If p > 0, applies inverted dropout with keep mask
    `hash(seed, global_row, global_col) >= p * 2**32` (keep-prob bias <= 2^-32).
    """
    pe_t = pe_ref[...].astype(x_ref.dtype)

    if p > 0.0:
        thresh = jnp.uint32(min(int(round(p * (2 ** 32))), (2 ** 32) - 1))
        scale = 1.0 / (1.0 - p)
        seed = seed_ref[0].astype(jnp.uint32)
        row0 = pl.program_id(0) * tile_rows
        col0 = pl.program_id(1) * (batch_block * d_model)
        shape = (tile_rows, d_model)
        rows_u = (lax.broadcasted_iota(jnp.int32, shape, 0) + row0).astype(jnp.uint32)
        cols_l = lax.broadcasted_iota(jnp.int32, shape, 1)

    for b in range(batch_block):                      # static unroll over batch slices
        sl = pl.ds(b * d_model, d_model)              # static lane offset
        y = x_ref[:, sl] + pe_t
        if p > 0.0:
            # Counter-based hash PRNG (murmur-style finalizer). VPU-only work:
            # free filler on an HBM-bound kernel, and portable (no pltpu.prng_*).
            cols_u = (cols_l + (col0 + b * d_model)).astype(jnp.uint32)
            h = rows_u * jnp.uint32(0x9E3779B1) + cols_u * jnp.uint32(0x85EBCA77) + seed
            h = h ^ (h >> 16)
            h = h * jnp.uint32(0x7FEB352D)
            h = h ^ (h >> 15)
            h = h * jnp.uint32(0x846CA68B)
            h = h ^ (h >> 16)
            y = jnp.where(h >= thresh, y * scale, jnp.zeros_like(y))
        o_ref[:, sl] = y.astype(o_ref.dtype)


# ---------------------------------------------------------------------------
# Tiling heuristics
# ---------------------------------------------------------------------------
def _choose_tiles(S, B, D, itemsize, target_bytes=8 << 20):
    """Pick (seq_tile, batches_per_lane_block, num_lane_blocks)."""
    d_bytes = D * itemsize
    # Split the lane dim on batch boundaries only when one full row exceeds the
    # tile target (needs D % 128 == 0 so lane blocks stay 128-aligned).
    if B * d_bytes > target_bytes and D % 128 == 0:
        bt = int(max(1, target_bytes // d_bytes))
    else:
        bt = B
        # TODO(synk): for huge B*D with D % 128 != 0, pad D (or regroup rows)
        # instead of taking one very wide lane block.
    nb = int(pl.cdiv(B, bt))

    ts = int((target_bytes // max(bt * d_bytes, 1)) // 8 * 8)
    if ts >= S:
        ts = S                                   # single full-extent tile along S
    else:
        ts = max(ts, 8)
    # v7x: 2 TensorCores share the 'parallel' grid axes — prefer >= 2 blocks
    # whenever S is long enough to split into multiple-of-8 tiles.
    if nb * pl.cdiv(S, ts) < 2 and S >= 16:
        ts = max(8, min(ts, _round_up(pl.cdiv(S, 2), 8)))
    return ts, bt, nb


# ---------------------------------------------------------------------------
# Wrapper
# ---------------------------------------------------------------------------
def positional_encoding(x, pe, *, p=0.1, training=False, seed=0, force_pallas=False):
    """x: (S, B, D);  pe: (max_len, 1, D).  Returns (S, B, D)."""
    S, B, D = x.shape
    assert pe.ndim == 3 and pe.shape[1] == 1
    assert pe.shape[0] >= S and pe.shape[2] == D
    assert 0.0 <= p < 1.0

    p_eff = float(p) if training else 0.0

    if p_eff == 0.0 and not force_pallas:
        # Eval mode: dropout is identity. A standalone mem-bound add is best
        # left to XLA so it fuses with the adjacent embedding/encoder ops.
        return x + pe[:S].astype(x.dtype)

    # Lane-dense layout plumbing (contiguous reshapes -> free at the XLA level).
    x2 = x.reshape(S, B * D)                          # (S, B*D)
    pe2 = pe.reshape(pe.shape[0], D).astype(x.dtype)  # cast once, DMA in act dtype

    itemsize = x.dtype.itemsize
    ts, bt, nb = _choose_tiles(S, B, D, itemsize)
    ns = int(pl.cdiv(S, ts))
    grid = (ns, nb)

    # Double-buffered x-in + out tiles plus the pe tile, capped with headroom
    # (v7x only has 64 MiB VMEM per TensorCore).
    x_tile_bytes = ts * bt * D * itemsize
    pe_tile_bytes = ts * D * itemsize
    vmem_limit = int(
        min(48 << 20, max(16 << 20, 2 * (2 * x_tile_bytes + pe_tile_bytes) + (2 << 20)))
    )

    kernel = functools.partial(
        _pe_kernel, batch_block=bt, d_model=D, p=p_eff, tile_rows=ts
    )
    seed_arr = jnp.asarray([seed], dtype=jnp.int32)

    out2 = pl.pallas_call(
        kernel,
        out_shape=jax.ShapeDtypeStruct((S, B * D), x.dtype),
        grid_spec=pltpu.PrefetchScalarGridSpec(
            num_scalar_prefetch=1,
            grid=grid,
            in_specs=[
                pl.BlockSpec((ts, bt * D), lambda i, j, s: (i, j)),  # x tile
                pl.BlockSpec((ts, D), lambda i, j, s: (i, 0)),       # pe tile (reused over j)
            ],
            out_specs=pl.BlockSpec((ts, bt * D), lambda i, j, s: (i, j)),
        ),
        compiler_params=pltpu.CompilerParams(
            dimension_semantics=("parallel", "parallel"),
            vmem_limit_bytes=vmem_limit,
        ),
    )(seed_arr, x2, pe2)

    return out2.reshape(S, B, D)


# ---------------------------------------------------------------------------
# Main
# ---------------------------------------------------------------------------
if __name__ == "__main__":
    # B*D = 256 (multiple of 128) so the lane-dense layout gets unmasked stores.
    seq_len, batch, d_model = 8, 2, 128
    max_len = 64

    key = jax.random.PRNGKey(0)
    x = jax.random.normal(key, (seq_len, batch, d_model), dtype=jnp.float32)
    pe = build_positional_encoding_table(max_len, d_model)

    ref = x + pe[:seq_len]

    # 1) Eval mode through the Pallas kernel (dropout == identity): exact check.
    out_eval = positional_encoding(x, pe, p=0.1, training=False, force_pallas=True)
    out_eval = jax.block_until_ready(out_eval)
    assert out_eval.shape == (seq_len, batch, d_model)
    assert jnp.allclose(out_eval, ref, atol=1e-6, rtol=1e-6)

    # 2) Default eval path (plain XLA add, fuses with neighbors): same numbers.
    out_xla = jax.block_until_ready(positional_encoding(x, pe, p=0.1, training=False))
    assert jnp.allclose(out_xla, ref, atol=1e-6, rtol=1e-6)

    # 3) Training mode (in-kernel inverted dropout): every element is either
    #    exactly 0 or (x+pe)/(1-p); and some (but not all) elements are dropped.
    p = 0.1
    out_train = positional_encoding(x, pe, p=p, training=True, seed=1234)
    out_train = jax.block_until_ready(out_train)
    scaled_ref = ref / (1.0 - p)
    is_zero = jnp.isclose(out_train, 0.0)
    is_kept = jnp.isclose(out_train, scaled_ref, atol=1e-5, rtol=1e-5)
    assert bool(jnp.all(is_zero | is_kept))
    keep_rate = float(jnp.mean(is_kept & ~is_zero))
    assert 0.5 < keep_rate < 1.0, f"unexpected keep rate {keep_rate}"

    print("KERNEL_OK")
</pallas_src>

<mosaic_0001>
module attributes {stable_mosaic.version = 11 : i64} {
  func.func @_pe_kernel(%arg0: i32, %arg1: i32, %arg2: memref<1xi32, #tpu.memory_space<smem>>, %arg3: memref<8x256xf32, #tpu.memory_space<vmem>>, %arg4: memref<8x128xf32, #tpu.memory_space<vmem>>, %arg5: memref<8x256xf32, #tpu.memory_space<vmem>>) attributes {dimension_semantics = [#tpu.dimension_semantics<parallel>, #tpu.dimension_semantics<parallel>], iteration_bounds = array<i64: 1, 1>, scalar_prefetch = 1 : i64, scratch_operands = 0 : i64, tpu.core_type = #tpu.core_type<tc>, window_params = [{transform_indices = @transform_0, window_bounds = array<i64: 8, 256>}, {transform_indices = @transform_1, window_bounds = array<i64: 8, 128>}, {transform_indices = @transform_2, window_bounds = array<i64: 8, 256>}]} {
    %c0 = arith.constant 0 : index
    %c0_0 = arith.constant 0 : index
    %0 = vector.load %arg4[%c0, %c0_0] : memref<8x128xf32, #tpu.memory_space<vmem>>, vector<8x128xf32>
    %c0_1 = arith.constant 0 : index
    %c0_2 = arith.constant 0 : index
    %1 = vector.load %arg3[%c0_1, %c0_2] : memref<8x256xf32, #tpu.memory_space<vmem>>, vector<8x128xf32>
    %2 = arith.addf %1, %0 : vector<8x128xf32>
    %c0_3 = arith.constant 0 : index
    %c0_4 = arith.constant 0 : index
    %3 = vector.load %arg5[%c0_3, %c0_4] : memref<8x256xf32, #tpu.memory_space<vmem>>, vector<8x128xf32>
    tpu.vector_store %arg5[%c0_3, %c0_4], %2 {strides = array<i32>} : memref<8x256xf32, #tpu.memory_space<vmem>>, vector<8x128xf32>,
    %c0_5 = arith.constant 0 : index
    %c128 = arith.constant 128 : index
    %4 = vector.load %arg3[%c0_5, %c128] : memref<8x256xf32, #tpu.memory_space<vmem>>, vector<8x128xf32>
    %5 = arith.addf %4, %0 : vector<8x128xf32>
    %c0_6 = arith.constant 0 : index
    %c128_7 = arith.constant 128 : index
    %6 = vector.load %arg5[%c0_6, %c128_7] : memref<8x256xf32, #tpu.memory_space<vmem>>, vector<8x128xf32>
    tpu.vector_store %arg5[%c0_6, %c128_7], %5 {strides = array<i32>} : memref<8x256xf32, #tpu.memory_space<vmem>>, vector<8x128xf32>,
    return
  }
  func.func @transform_0(%arg0: i32, %arg1: i32, %arg2: memref<1xi32, #tpu.memory_space<smem>>) -> (i32, i32) {
    %c0_i32 = arith.constant 0 : i32
    return %arg0, %arg1 : i32, i32
  }
  func.func @transform_1(%arg0: i32, %arg1: i32, %arg2: memref<1xi32, #tpu.memory_space<smem>>) -> (i32, i32) {
    %c0_i32 = arith.constant 0 : i32
    %c0_i32_0 = arith.constant 0 : i32
    return %arg0, %c0_i32 : i32, i32
  }
  func.func @transform_2(%arg0: i32, %arg1: i32, %arg2: memref<1xi32, #tpu.memory_space<smem>>) -> (i32, i32) {
    %c0_i32 = arith.constant 0 : i32
    return %arg0, %arg1 : i32, i32
  }
}

</mosaic_0001>

<bundles_post_ra>
// kernel: tpu_custom_call.1
= control target key start
LH: loop header
LB: loop body
LE: loop exit
PB: predicated region body
PF: predicated region fallthrough
CT: control target
= control target key end

     0   :  { %9 = vsyncpa [#allocation5], 0  ;;  %s180_s0 = inlined_call_operand.<no memory space> [shape: s32[1], index: 0, kind: input, shape index: {}]   ;;  %s181_s1 = inlined_call_operand.hbm [shape: f32[8,256], index: 1, kind: input, shape index: {}]   ;;  %s182_s2 = inlined_call_operand.hbm [shape: f32[64,128], index: 2, kind: input, shape index: {}]   ;;  %s183_s3 = inlined_call_operand.hbm [shape: f32[8,256], index: 3, kind: output, shape index: {}]  }
   0x1   :  { %10 = vsyncpa [#allocation8], 0 }
   0x2   :  { %11 = vsyncpa [#allocation6], 0  ;;  %s17_s14 = sshll.u32 %s181_s1, 4  ;;  %s148_s15 = smov [#allocation4]   ;;  %s18_s14 = int_to_ptr.hbm [resolvable:$true] %s17_s14 }
   0x3   :  { %s19_s16 = sshll.u32 %s148_s15, 4  ;;  %s28_s18 = sshll.u32 %s182_s2, 4  ;;  %s20_s16 = int_to_ptr.vmem [resolvable:$true] %s19_s16  ;;  %s29_s18 = int_to_ptr.hbm [resolvable:$true] %s28_s18 }
   0x4   :  { %22 = dma.hbm_to_vmem [thread:$0]  %s18_s14, 256, %s20_s16, [#allocation5]  }
   0x5   :  { %s149_s19 = smov [#allocation7]  }
   0x6   :  { %s30_s20 = sshll.u32 %s149_s19, 4  ;;  %s31_s20 = int_to_ptr.vmem [resolvable:$true] %s30_s20 }
   0x7   :  { %33 = dma.hbm_to_vmem [thread:$0]  %s29_s18, 128, %s31_s20, [#allocation8]  }
   0x8   :  { %142 = dma.done.wait [#allocation5], 256  }
   0x9   :  { %143 = vsyncadd [#allocation5], 4294967040 }
   0xa   :  { %144 = dma.done.wait [#allocation8], 128  }
   0xb   :  { %145 = vsyncadd [#allocation8], 4294967168  ;;  %s150_s21 = smov [#allocation9]   ;;  %s56_s24 = sshll.u32 %s183_s3, 4  ;;  %v42_v0 = vld [vmem:[#allocation7] sm:$0xff]  ;;  %v43_v1 = vld [vmem:[#allocation4] sm:$0xff]  ;;  %s57_s24 = int_to_ptr.hbm [resolvable:$true] %s56_s24 }
   0xc   :  { %s54_s1 = sshll.u32 %s150_s21, 4  ;;  %v46_v2 = vld [vmem:[#allocation4 + $0x8] sm:$0xff]  ;;  %v44_v3 = vadd.f32 %v43_v1, %v42_v0  ;;  %s55_s1 = int_to_ptr.vmem [resolvable:$true] %s54_s1 }
   0xd   :  { %v47_v4 = vadd.f32 %v46_v2, %v42_v0 }
   0xe   :  { %45 = vst [vmem:[#allocation9] sm:$0xff] %v44_v3 }
   0xf   :  { %48 = vst [vmem:[#allocation9 + $0x8] sm:$0xff] %v47_v4 }
  0x10   :  { %59 = dma.vmem_to_hbm [thread:$0]  %s55_s1, 256, %s57_s24, [#allocation6]  }
  0x11   :  { %146 = dma.done.wait [#allocation6], 256  }
  0x12   :  { %147 = vsyncadd [#allocation6], 4294967040 }
  0x13   :  { %64 = vsyncpa [#allocation5], 1 }
  0x14   :  { %65 = vsyncpa [#allocation8], 1 }
  0x15   :  { %66 = vsyncpa [#allocation6], 1 }

</bundles_post_ra>
